<compile_context>
chip_gen: v5e
topology: v5e:2x2
jax: 0.10.0
libtpu: 0.0.40
codegen_flags: <defaults>
</compile_context>

<pallas_src>
import numpy as np
import jax
import jax.numpy as jnp
from jax.experimental import pallas as pl
from jax.experimental.pallas import tpu as pltpu

_ROW_PAD = 8  # zero rows kept above the image rows inside the VMEM scratch


# ---------------------------------------------------------------------------
# Pallas kernel: one fused UpCat block (concat + zero-pad + conv/BN/ReLU x2)
# ---------------------------------------------------------------------------
def _make_upcat_kernel(has_skip: bool):
    def kernel(*refs):
        if has_skip:
            (x_ref, s_ref, wx_ref, ws_ref, sc1_ref, b1_ref,
             w2_ref, sc2_ref, b2_ref, o_ref, x_scr, s_scr, x1_scr) = refs
        else:
            (x_ref, wx_ref, sc1_ref, b1_ref,
             w2_ref, sc2_ref, b2_ref, o_ref, x_scr, x1_scr) = refs
            s_ref = ws_ref = s_scr = None

        H = x_ref.shape[1]
        n1 = sc1_ref.shape[-1]          # W * out_chns (conv1 output row width)
        n2 = o_ref.shape[-1]            # W * out_chns (conv2 output row width)

        # ---- zero-pad along H inside VMEM scratch (aligned writes only) ----
        x_scr[...] = jnp.zeros_like(x_scr)
        x_scr[_ROW_PAD:_ROW_PAD + H, :] = x_ref[0]
        if has_skip:
            s_scr[...] = jnp.zeros_like(s_scr)
            s_scr[_ROW_PAD:_ROW_PAD + H, :] = s_ref[0]

        x_pad = x_scr[...]
        s_pad = s_scr[...] if has_skip else None

        # ---- conv1 (+ folded BN + ReLU): 3 banded MXU matmuls per stream ----
        acc = jnp.zeros((H, n1), jnp.float32)
        for ky in range(3):                      # statically unrolled
            lo = _ROW_PAD - 1 + ky
            lhs = x_pad[lo:lo + H, :].astype(jnp.bfloat16)
            acc = acc + jnp.dot(lhs, wx_ref[ky],
                                preferred_element_type=jnp.float32)
            if has_skip:
                lhs_s = s_pad[lo:lo + H, :].astype(jnp.bfloat16)
                acc = acc + jnp.dot(lhs_s, ws_ref[ky],
                                    preferred_element_type=jnp.float32)
        y1 = jnp.maximum(acc * sc1_ref[...] + b1_ref[...], 0.0)   # f32 epilogue

        # ---- conv2 (+ folded BN + ReLU): intermediate never leaves VMEM ----
        x1_scr[...] = jnp.zeros_like(x1_scr)
        x1_scr[_ROW_PAD:_ROW_PAD + H, :] = y1
        x1_pad = x1_scr[...]
        acc2 = jnp.zeros((H, n2), jnp.float32)
        for ky in range(3):
            lo = _ROW_PAD - 1 + ky
            lhs = x1_pad[lo:lo + H, :].astype(jnp.bfloat16)
            acc2 = acc2 + jnp.dot(lhs, w2_ref[ky],
                                  preferred_element_type=jnp.float32)
        y2 = jnp.maximum(acc2 * sc2_ref[...] + b2_ref[...], 0.0)
        o_ref[0] = y2.astype(o_ref.dtype)        # lane-dense (H, W*Cout) store

    return kernel


def _upcat_pallas_call(x_f, s_f, wx, ws, sc1, b1, w2, sc2, b2):
    """x_f: (B, H, W*Cx) f32 row-flattened upsampled input.
       s_f: (B, H, W*Cs) f32 row-flattened skip, or None.
       wx/ws/w2: (3, K, N) bf16 banded conv weights.  sc*/b*: (1, N) f32."""
    B, H, wcx = x_f.shape
    n1 = sc1.shape[-1]
    n2 = sc2.shape[-1]
    has_skip = s_f is not None

    in_specs = [pl.BlockSpec((1, H, wcx), lambda b: (b, 0, 0))]
    args = [x_f]
    scratch = [pltpu.VMEM((H + 2 * _ROW_PAD, wcx), jnp.float32)]
    if has_skip:
        wcs = s_f.shape[-1]
        in_specs.append(pl.BlockSpec((1, H, wcs), lambda b: (b, 0, 0)))
        args.append(s_f)
        scratch.append(pltpu.VMEM((H + 2 * _ROW_PAD, wcs), jnp.float32))
    scratch.append(pltpu.VMEM((H + 2 * _ROW_PAD, n1), jnp.float32))

    in_specs.append(pl.BlockSpec(wx.shape, lambda b: (0, 0, 0)))
    args.append(wx)
    if has_skip:
        in_specs.append(pl.BlockSpec(ws.shape, lambda b: (0, 0, 0)))
        args.append(ws)
    for arr in (sc1, b1):
        in_specs.append(pl.BlockSpec((1, n1), lambda b: (0, 0)))
        args.append(arr)
    in_specs.append(pl.BlockSpec(w2.shape, lambda b: (0, 0, 0)))
    args.append(w2)
    for arr in (sc2, b2):
        in_specs.append(pl.BlockSpec((1, n2), lambda b: (0, 0)))
        args.append(arr)

    return pl.pallas_call(
        _make_upcat_kernel(has_skip),
        out_shape=jax.ShapeDtypeStruct((B, H, n2), jnp.float32),
        grid=(B,),
        in_specs=in_specs,
        out_specs=pl.BlockSpec((1, H, n2), lambda b: (b, 0, 0)),
        scratch_shapes=scratch,
        compiler_params=pltpu.CompilerParams(
            dimension_semantics=("parallel",),          # megacore on v7x
            vmem_limit_bytes=48 * 1024 * 1024),
    )(*args)


# ---------------------------------------------------------------------------
# Host-side weight preparation
# ---------------------------------------------------------------------------
def _band_matrices(w9_np, W):
    """Fold the 3 kx taps + W-direction zero padding of a 3x3 conv into three
    block-banded matrices of shape (W*Cin, W*Cout), one per ky tap."""
    _, cin, cout = w9_np.shape
    band = np.zeros((3, W * cin, W * cout), np.float32)
    for ky in range(3):
        for kx in range(3):
            tap = w9_np[3 * ky + kx]                     # (Cin, Cout)
            for xo in range(W):
                xi = xo + kx - 1                         # input column for this tap
                if 0 <= xi < W:
                    band[ky, xi * cin:(xi + 1) * cin,
                         xo * cout:(xo + 1) * cout] = tap
    return band


def _make_conv_bn_params(key, cin, cout, eps=1e-5):
    """Deterministic synthetic params: conv weight (9 taps) + eval-mode BN folded.
    w9[t, ci, co] == torch_weight[co, ci, t // 3, t % 3]."""
    k1, k2, k3, k4, k5 = jax.random.split(key, 5)
    w9 = jax.random.normal(k1, (9, cin, cout), jnp.float32) / (3.0 * jnp.sqrt(float(cin)))
    gamma = 1.0 + 0.1 * jax.random.normal(k2, (cout,), jnp.float32)
    beta = 0.1 * jax.random.normal(k3, (cout,), jnp.float32)
    rmean = 0.1 * jax.random.normal(k4, (cout,), jnp.float32)
    rvar = jnp.abs(1.0 + 0.1 * jax.random.normal(k5, (cout,), jnp.float32))
    scale = gamma / jnp.sqrt(rvar + eps)
    bias = beta - rmean * scale
    return w9, scale, bias


def _ref_conv_bn_relu(x, w9, scale, bias):
    """Pure-JAX reference conv+BN+ReLU with the same bf16 rounding points."""
    cin, cout = w9.shape[1], w9.shape[2]
    xb = x.astype(jnp.bfloat16).astype(jnp.float32)
    wb = w9.astype(jnp.bfloat16).astype(jnp.float32).reshape(3, 3, cin, cout)
    y = jax.lax.conv_general_dilated(
        xb, wb, window_strides=(1, 1), padding="SAME",
        dimension_numbers=("NHWC", "HWIO", "NHWC"),
        precision=jax.lax.Precision.HIGHEST)
    y = y * scale.reshape(1, 1, 1, cout) + bias.reshape(1, 1, 1, cout)
    return jnp.maximum(y, 0.0)


# ---------------------------------------------------------------------------
# Decoder module
# ---------------------------------------------------------------------------
class UNetDecoderPallas:
    """Eval-mode UNetDecoder forward (dim=2) built from fused Pallas UpCat kernels."""

    def __init__(self, encoder_channels, decoder_channels, key,
                 upsample="nontrainable", pre_conv=None):
        assert len(encoder_channels) >= 2
        assert len(decoder_channels) == len(encoder_channels) - 1
        in_channels = [encoder_channels[-1]] + list(decoder_channels[:-1])
        skip_channels = list(encoder_channels[1:-1][::-1]) + [0]
        halves = [True] * (len(skip_channels) - 1) + [False]

        self.blocks = []
        self._prepared_cache = {}
        for bi, (ic, sc, oc, hv) in enumerate(zip(in_channels, skip_channels,
                                                  decoder_channels, halves)):
            # UpCat channel bookkeeping: nontrainable + pre_conv=None => no halving
            if upsample == "nontrainable" and pre_conv is None:
                up_chns = ic
            else:
                up_chns = ic // 2 if hv else ic
            kb = jax.random.fold_in(key, bi)
            w9_1, s1, b1 = _make_conv_bn_params(jax.random.fold_in(kb, 0),
                                                sc + up_chns, oc)
            w9_2, s2, b2 = _make_conv_bn_params(jax.random.fold_in(kb, 1), oc, oc)
            self.blocks.append(dict(cat_chns=sc, up_chns=up_chns, out_chns=oc,
                                    w9_1=w9_1, s1=s1, b1=b1,
                                    w9_2=w9_2, s2=s2, b2=b2))

    def _prepared(self, bi, W):
        """Banded bf16 weights (W-dependent) + W-tiled f32 BN scale/bias, cached."""
        ck = (bi, W)
        if ck in self._prepared_cache:
            return self._prepared_cache[ck]
        blk = self.blocks[bi]
        cs, oc = blk["cat_chns"], blk["out_chns"]
        w9_1 = np.asarray(blk["w9_1"], np.float32)
        wx = jnp.asarray(_band_matrices(w9_1[:, cs:, :], W), jnp.bfloat16)
        ws = (jnp.asarray(_band_matrices(w9_1[:, :cs, :], W), jnp.bfloat16)
              if cs > 0 else None)
        w2 = jnp.asarray(_band_matrices(np.asarray(blk["w9_2"], np.float32), W),
                         jnp.bfloat16)
        sc1 = jnp.tile(blk["s1"], W).reshape(1, W * oc)
        b1 = jnp.tile(blk["b1"], W).reshape(1, W * oc)
        sc2 = jnp.tile(blk["s2"], W).reshape(1, W * oc)
        b2 = jnp.tile(blk["b2"], W).reshape(1, W * oc)
        ops = (wx, ws, sc1, b1, w2, sc2, b2)
        self._prepared_cache[ck] = ops
        return ops

    def _upcat(self, bi, x, skip):
        B, _, _, cx = x.shape
        # UpSample(nontrainable, pre_conv=None, nearest, x2) kept in XLA.
        # TODO(synk): fold the upsample into the band weights (even/odd rows)
        # to also remove this HBM round trip.
        x0 = jnp.repeat(jnp.repeat(x, 2, axis=1), 2, axis=2)
        if skip is not None:
            ph = skip.shape[1] - x0.shape[1]
            pw = skip.shape[2] - x0.shape[2]
            if ph or pw:   # MONAI UpCat is_pad: replicate-pad at the far edge
                x0 = jnp.pad(x0, ((0, 0), (0, ph), (0, pw), (0, 0)), mode="edge")
            H, W = skip.shape[1], skip.shape[2]
        else:
            H, W = x0.shape[1], x0.shape[2]

        wx, ws, sc1, b1, w2, sc2, b2 = self._prepared(bi, W)
        x_f = x0.reshape(B, H, W * cx)                                    # row-flatten
        s_f = (skip.reshape(B, H, W * skip.shape[-1]) if skip is not None else None)
        # TODO(synk): dropout is 0.0 (identity) per ranzcrnet config; non-zero
        # dropout is not implemented in the fused kernel.
        out = _upcat_pallas_call(x_f, s_f, wx, ws, sc1, b1, w2, sc2, b2)
        return out.reshape(B, H, W, self.blocks[bi]["out_chns"])

    def __call__(self, features_nchw):
        feats = [jnp.transpose(f, (0, 2, 3, 1)) for f in features_nchw]  # NCHW->NHWC
        skips = feats[:-1][::-1]
        feats_r = feats[1:][::-1]
        x = feats_r[0]
        for bi in range(len(self.blocks)):
            skip = skips[bi] if bi < len(skips) else None
            x = self._upcat(bi, x, skip)
        return jnp.transpose(x, (0, 3, 1, 2))                            # back to NCHW

    def reference(self, features_nchw):
        """Pure-JAX (XLA) reference forward with matching bf16 rounding points."""
        feats = [jnp.transpose(f, (0, 2, 3, 1)) for f in features_nchw]
        skips = feats[:-1][::-1]
        feats_r = feats[1:][::-1]
        x = feats_r[0]
        for bi, blk in enumerate(self.blocks):
            skip = skips[bi] if bi < len(skips) else None
            x0 = jnp.repeat(jnp.repeat(x, 2, axis=1), 2, axis=2)
            if skip is not None:
                ph = skip.shape[1] - x0.shape[1]
                pw = skip.shape[2] - x0.shape[2]
                if ph or pw:
                    x0 = jnp.pad(x0, ((0, 0), (0, ph), (0, pw), (0, 0)), mode="edge")
                x0 = jnp.concatenate([skip, x0], axis=-1)
            x1 = _ref_conv_bn_relu(x0, blk["w9_1"], blk["s1"], blk["b1"])
            x = _ref_conv_bn_relu(x1, blk["w9_2"], blk["s2"], blk["b2"])
        return jnp.transpose(x, (0, 3, 1, 2))


if __name__ == "__main__":
    key = jax.random.PRNGKey(0)
    B = 2
    # encoder_channels[0] is the network input channel count (unused by the decoder)
    encoder_channels = (3, 8, 16, 32)
    decoder_channels = (16, 8, 4)
    # Encoder stage outputs (len == len(encoder_channels) - 1), NCHW, strides 1/2/4
    feature_shapes = [(B, 8, 16, 16), (B, 16, 8, 8), (B, 32, 4, 4)]

    fkeys = jax.random.split(key, len(feature_shapes) + 1)
    features = [jax.random.normal(fkeys[i], s, jnp.float32)
                for i, s in enumerate(feature_shapes)]

    decoder = UNetDecoderPallas(encoder_channels, decoder_channels, key=fkeys[-1])
    out = jax.block_until_ready(decoder(features))
    assert out.shape == (B, decoder_channels[-1], 32, 32), out.shape
    assert bool(jnp.isfinite(out).all())

    # Numerical sanity check against the pure-JAX reference.
    ref = jax.block_until_ready(decoder.reference(features))
    max_err = float(jnp.max(jnp.abs(out - ref)))
    assert max_err < 3e-2, f"max abs err vs reference: {max_err}"
    print("KERNEL_OK")
</pallas_src>

<mosaic_0001>
module attributes {stable_mosaic.version = 11 : i64} {
  func.func @kernel(%arg0: i32, %arg1: memref<1x8x256xf32, #tpu.memory_space<vmem>>, %arg2: memref<1x8x128xf32, #tpu.memory_space<vmem>>, %arg3: memref<3x256x128xbf16, #tpu.memory_space<vmem>>, %arg4: memref<3x128x128xbf16, #tpu.memory_space<vmem>>, %arg5: memref<1x128xf32, #tpu.memory_space<vmem>>, %arg6: memref<1x128xf32, #tpu.memory_space<vmem>>, %arg7: memref<3x128x128xbf16, #tpu.memory_space<vmem>>, %arg8: memref<1x128xf32, #tpu.memory_space<vmem>>, %arg9: memref<1x128xf32, #tpu.memory_space<vmem>>, %arg10: memref<1x8x128xf32, #tpu.memory_space<vmem>>, %arg11: memref<24x256xf32, #tpu.memory_space<vmem>>, %arg12: memref<24x128xf32, #tpu.memory_space<vmem>>, %arg13: memref<24x128xf32, #tpu.memory_space<vmem>>) attributes {dimension_semantics = [#tpu.dimension_semantics<parallel>], iteration_bounds = array<i64: 2>, scalar_prefetch = 0 : i64, scratch_operands = 3 : i64, tpu.core_type = #tpu.core_type<tc>, window_params = [{transform_indices = @transform_0, window_bounds = array<i64: 1, 8, 256>}, {transform_indices = @transform_1, window_bounds = array<i64: 1, 8, 128>}, {pipeline_mode = #tpu.pipeline_mode<synchronous>, transform_indices = @transform_2, window_bounds = array<i64: 3, 256, 128>}, {pipeline_mode = #tpu.pipeline_mode<synchronous>, transform_indices = @transform_3, window_bounds = array<i64: 3, 128, 128>}, {pipeline_mode = #tpu.pipeline_mode<synchronous>, transform_indices = @transform_4, window_bounds = array<i64: 1, 128>}, {pipeline_mode = #tpu.pipeline_mode<synchronous>, transform_indices = @transform_5, window_bounds = array<i64: 1, 128>}, {pipeline_mode = #tpu.pipeline_mode<synchronous>, transform_indices = @transform_6, window_bounds = array<i64: 3, 128, 128>}, {pipeline_mode = #tpu.pipeline_mode<synchronous>, transform_indices = @transform_7, window_bounds = array<i64: 1, 128>}, {pipeline_mode = #tpu.pipeline_mode<synchronous>, transform_indices = @transform_8, window_bounds = array<i64: 1, 128>}, {transform_indices = @transform_9, window_bounds = array<i64: 1, 8, 128>}]} {
    %cst = arith.constant 0.000000e+00 : f32
    %0 = vector.broadcast %cst : f32 to vector<24x256xf32>
    %c0 = arith.constant 0 : index
    %c0_0 = arith.constant 0 : index
    %1 = vector.load %arg11[%c0, %c0_0] : memref<24x256xf32, #tpu.memory_space<vmem>>, vector<24x256xf32>
    tpu.vector_store %arg11[%c0, %c0_0], %0 {strides = array<i32>} : memref<24x256xf32, #tpu.memory_space<vmem>>, vector<24x256xf32>,
    %c0_1 = arith.constant 0 : index
    %c0_2 = arith.constant 0 : index
    %c0_3 = arith.constant 0 : index
    %2 = vector.load %arg1[%c0_1, %c0_2, %c0_3] : memref<1x8x256xf32, #tpu.memory_space<vmem>>, vector<1x8x256xf32>
    %3 = vector.shape_cast %2 : vector<1x8x256xf32> to vector<8x256xf32>
    %c8 = arith.constant 8 : index
    %c0_4 = arith.constant 0 : index
    %4 = vector.load %arg11[%c8, %c0_4] : memref<24x256xf32, #tpu.memory_space<vmem>>, vector<8x256xf32>
    tpu.vector_store %arg11[%c8, %c0_4], %3 {strides = array<i32>} : memref<24x256xf32, #tpu.memory_space<vmem>>, vector<8x256xf32>,
    %cst_5 = arith.constant 0.000000e+00 : f32
    %5 = vector.broadcast %cst_5 : f32 to vector<24x128xf32>
    %c0_6 = arith.constant 0 : index
    %c0_7 = arith.constant 0 : index
    %6 = vector.load %arg12[%c0_6, %c0_7] : memref<24x128xf32, #tpu.memory_space<vmem>>, vector<24x128xf32>
    tpu.vector_store %arg12[%c0_6, %c0_7], %5 {strides = array<i32>} : memref<24x128xf32, #tpu.memory_space<vmem>>, vector<24x128xf32>,
    %c0_8 = arith.constant 0 : index
    %c0_9 = arith.constant 0 : index
    %c0_10 = arith.constant 0 : index
    %7 = vector.load %arg2[%c0_8, %c0_9, %c0_10] : memref<1x8x128xf32, #tpu.memory_space<vmem>>, vector<1x8x128xf32>
    %8 = vector.shape_cast %7 : vector<1x8x128xf32> to vector<8x128xf32>
    %c8_11 = arith.constant 8 : index
    %c0_12 = arith.constant 0 : index
    %9 = vector.load %arg12[%c8_11, %c0_12] : memref<24x128xf32, #tpu.memory_space<vmem>>, vector<8x128xf32>
    tpu.vector_store %arg12[%c8_11, %c0_12], %8 {strides = array<i32>} : memref<24x128xf32, #tpu.memory_space<vmem>>, vector<8x128xf32>,
    %c0_13 = arith.constant 0 : index
    %c0_14 = arith.constant 0 : index
    %10 = vector.load %arg11[%c0_13, %c0_14] : memref<24x256xf32, #tpu.memory_space<vmem>>, vector<24x256xf32>
    %c0_15 = arith.constant 0 : index
    %c0_16 = arith.constant 0 : index
    %11 = vector.load %arg12[%c0_15, %c0_16] : memref<24x128xf32, #tpu.memory_space<vmem>>, vector<24x128xf32>
    %cst_17 = arith.constant 0.000000e+00 : f32
    %12 = vector.broadcast %cst_17 : f32 to vector<8x128xf32>
    %13 = vector.extract_strided_slice %10 {offsets = [7, 0], sizes = [8, 256], strides = [1, 1]} : vector<24x256xf32> to vector<8x256xf32>
    %14 = arith.truncf %13 : vector<8x256xf32> to vector<8x256xbf16>
    %c0_18 = arith.constant 0 : index
    %c0_19 = arith.constant 0 : index
    %c0_20 = arith.constant 0 : index
    %15 = vector.load %arg3[%c0_18, %c0_19, %c0_20] : memref<3x256x128xbf16, #tpu.memory_space<vmem>>, vector<1x256x128xbf16>
    %16 = vector.shape_cast %15 : vector<1x256x128xbf16> to vector<256x128xbf16>
    %cst_21 = arith.constant dense<0.000000e+00> : vector<8x128xf32>
    %17 = tpu.matmul %14, %16, %cst_21 {dimension_numbers = #tpu.dot_dimension_numbers<[1], [0], [0], [1], [0, 0, 1, 1], [], []>} : vector<8x256xbf16>, vector<256x128xbf16>, vector<8x128xf32> -> vector<8x128xf32>
    %18 = arith.addf %12, %17 : vector<8x128xf32>
    %19 = vector.extract_strided_slice %11 {offsets = [7, 0], sizes = [8, 128], strides = [1, 1]} : vector<24x128xf32> to vector<8x128xf32>
    %20 = arith.truncf %19 : vector<8x128xf32> to vector<8x128xbf16>
    %c0_22 = arith.constant 0 : index
    %c0_23 = arith.constant 0 : index
    %c0_24 = arith.constant 0 : index
    %21 = vector.load %arg4[%c0_22, %c0_23, %c0_24] : memref<3x128x128xbf16, #tpu.memory_space<vmem>>, vector<1x128x128xbf16>
    %22 = vector.shape_cast %21 : vector<1x128x128xbf16> to vector<128x128xbf16>
    %cst_25 = arith.constant dense<0.000000e+00> : vector<8x128xf32>
    %23 = tpu.matmul %20, %22, %cst_25 {dimension_numbers = #tpu.dot_dimension_numbers<[1], [0], [0], [1], [0, 0, 1, 1], [], []>} : vector<8x128xbf16>, vector<128x128xbf16>, vector<8x128xf32> -> vector<8x128xf32>
    %24 = arith.addf %18, %23 : vector<8x128xf32>
    %25 = vector.extract_strided_slice %10 {offsets = [8, 0], sizes = [8, 256], strides = [1, 1]} : vector<24x256xf32> to vector<8x256xf32>
    %26 = arith.truncf %25 : vector<8x256xf32> to vector<8x256xbf16>
    %c1 = arith.constant 1 : index
    %c0_26 = arith.constant 0 : index
    %c0_27 = arith.constant 0 : index
    %27 = vector.load %arg3[%c1, %c0_26, %c0_27] : memref<3x256x128xbf16, #tpu.memory_space<vmem>>, vector<1x256x128xbf16>
    %28 = vector.shape_cast %27 : vector<1x256x128xbf16> to vector<256x128xbf16>
    %cst_28 = arith.constant dense<0.000000e+00> : vector<8x128xf32>
    %29 = tpu.matmul %26, %28, %cst_28 {dimension_numbers = #tpu.dot_dimension_numbers<[1], [0], [0], [1], [0, 0, 1, 1], [], []>} : vector<8x256xbf16>, vector<256x128xbf16>, vector<8x128xf32> -> vector<8x128xf32>
    %30 = arith.addf %24, %29 : vector<8x128xf32>
    %31 = vector.extract_strided_slice %11 {offsets = [8, 0], sizes = [8, 128], strides = [1, 1]} : vector<24x128xf32> to vector<8x128xf32>
    %32 = arith.truncf %31 : vector<8x128xf32> to vector<8x128xbf16>
    %c1_29 = arith.constant 1 : index
    %c0_30 = arith.constant 0 : index
    %c0_31 = arith.constant 0 : index
    %33 = vector.load %arg4[%c1_29, %c0_30, %c0_31] : memref<3x128x128xbf16, #tpu.memory_space<vmem>>, vector<1x128x128xbf16>
    %34 = vector.shape_cast %33 : vector<1x128x128xbf16> to vector<128x128xbf16>
    %cst_32 = arith.constant dense<0.000000e+00> : vector<8x128xf32>
    %35 = tpu.matmul %32, %34, %cst_32 {dimension_numbers = #tpu.dot_dimension_numbers<[1], [0], [0], [1], [0, 0, 1, 1], [], []>} : vector<8x128xbf16>, vector<128x128xbf16>, vector<8x128xf32> -> vector<8x128xf32>
    %36 = arith.addf %30, %35 : vector<8x128xf32>
    %37 = vector.extract_strided_slice %10 {offsets = [9, 0], sizes = [8, 256], strides = [1, 1]} : vector<24x256xf32> to vector<8x256xf32>
    %38 = arith.truncf %37 : vector<8x256xf32> to vector<8x256xbf16>
    %c2 = arith.constant 2 : index
    %c0_33 = arith.constant 0 : index
    %c0_34 = arith.constant 0 : index
    %39 = vector.load %arg3[%c2, %c0_33, %c0_34] : memref<3x256x128xbf16, #tpu.memory_space<vmem>>, vector<1x256x128xbf16>
    %40 = vector.shape_cast %39 : vector<1x256x128xbf16> to vector<256x128xbf16>
    %cst_35 = arith.constant dense<0.000000e+00> : vector<8x128xf32>
    %41 = tpu.matmul %38, %40, %cst_35 {dimension_numbers = #tpu.dot_dimension_numbers<[1], [0], [0], [1], [0, 0, 1, 1], [], []>} : vector<8x256xbf16>, vector<256x128xbf16>, vector<8x128xf32> -> vector<8x128xf32>
    %42 = arith.addf %36, %41 : vector<8x128xf32>
    %43 = vector.extract_strided_slice %11 {offsets = [9, 0], sizes = [8, 128], strides = [1, 1]} : vector<24x128xf32> to vector<8x128xf32>
    %44 = arith.truncf %43 : vector<8x128xf32> to vector<8x128xbf16>
    %c2_36 = arith.constant 2 : index
    %c0_37 = arith.constant 0 : index
    %c0_38 = arith.constant 0 : index
    %45 = vector.load %arg4[%c2_36, %c0_37, %c0_38] : memref<3x128x128xbf16, #tpu.memory_space<vmem>>, vector<1x128x128xbf16>
    %46 = vector.shape_cast %45 : vector<1x128x128xbf16> to vector<128x128xbf16>
    %cst_39 = arith.constant dense<0.000000e+00> : vector<8x128xf32>
    %47 = tpu.matmul %44, %46, %cst_39 {dimension_numbers = #tpu.dot_dimension_numbers<[1], [0], [0], [1], [0, 0, 1, 1], [], []>} : vector<8x128xbf16>, vector<128x128xbf16>, vector<8x128xf32> -> vector<8x128xf32>
    %48 = arith.addf %42, %47 : vector<8x128xf32>
    %c0_40 = arith.constant 0 : index
    %c0_41 = arith.constant 0 : index
    %49 = vector.load %arg5[%c0_40, %c0_41] : memref<1x128xf32, #tpu.memory_space<vmem>>, vector<1x128xf32>
    %50 = vector.broadcast %49 : vector<1x128xf32> to vector<8x128xf32>
    %51 = arith.mulf %48, %50 : vector<8x128xf32>
    %c0_42 = arith.constant 0 : index
    %c0_43 = arith.constant 0 : index
    %52 = vector.load %arg6[%c0_42, %c0_43] : memref<1x128xf32, #tpu.memory_space<vmem>>, vector<1x128xf32>
    %53 = vector.broadcast %52 : vector<1x128xf32> to vector<8x128xf32>
    %54 = arith.addf %51, %53 : vector<8x128xf32>
    %cst_44 = arith.constant 0.000000e+00 : f32
    %55 = vector.broadcast %cst_44 : f32 to vector<8x128xf32>
    %56 = arith.maximumf %54, %55 : vector<8x128xf32>
    %cst_45 = arith.constant 0.000000e+00 : f32
    %57 = vector.broadcast %cst_45 : f32 to vector<24x128xf32>
    %c0_46 = arith.constant 0 : index
    %c0_47 = arith.constant 0 : index
    %58 = vector.load %arg13[%c0_46, %c0_47] : memref<24x128xf32, #tpu.memory_space<vmem>>, vector<24x128xf32>
    tpu.vector_store %arg13[%c0_46, %c0_47], %57 {strides = array<i32>} : memref<24x128xf32, #tpu.memory_space<vmem>>, vector<24x128xf32>,
    %c8_48 = arith.constant 8 : index
    %c0_49 = arith.constant 0 : index
    %59 = vector.load %arg13[%c8_48, %c0_49] : memref<24x128xf32, #tpu.memory_space<vmem>>, vector<8x128xf32>
    tpu.vector_store %arg13[%c8_48, %c0_49], %56 {strides = array<i32>} : memref<24x128xf32, #tpu.memory_space<vmem>>, vector<8x128xf32>,
    %c0_50 = arith.constant 0 : index
    %c0_51 = arith.constant 0 : index
    %60 = vector.load %arg13[%c0_50, %c0_51] : memref<24x128xf32, #tpu.memory_space<vmem>>, vector<24x128xf32>
    %cst_52 = arith.constant 0.000000e+00 : f32
    %61 = vector.broadcast %cst_52 : f32 to vector<8x128xf32>
    %62 = vector.extract_strided_slice %60 {offsets = [7, 0], sizes = [8, 128], strides = [1, 1]} : vector<24x128xf32> to vector<8x128xf32>
    %63 = arith.truncf %62 : vector<8x128xf32> to vector<8x128xbf16>
    %c0_53 = arith.constant 0 : index
    %c0_54 = arith.constant 0 : index
    %c0_55 = arith.constant 0 : index
    %64 = vector.load %arg7[%c0_53, %c0_54, %c0_55] : memref<3x128x128xbf16, #tpu.memory_space<vmem>>, vector<1x128x128xbf16>
    %65 = vector.shape_cast %64 : vector<1x128x128xbf16> to vector<128x128xbf16>
    %cst_56 = arith.constant dense<0.000000e+00> : vector<8x128xf32>
    %66 = tpu.matmul %63, %65, %cst_56 {dimension_numbers = #tpu.dot_dimension_numbers<[1], [0], [0], [1], [0, 0, 1, 1], [], []>} : vector<8x128xbf16>, vector<128x128xbf16>, vector<8x128xf32> -> vector<8x128xf32>
    %67 = arith.addf %61, %66 : vector<8x128xf32>
    %68 = vector.extract_strided_slice %60 {offsets = [8, 0], sizes = [8, 128], strides = [1, 1]} : vector<24x128xf32> to vector<8x128xf32>
    %69 = arith.truncf %68 : vector<8x128xf32> to vector<8x128xbf16>
    %c1_57 = arith.constant 1 : index
    %c0_58 = arith.constant 0 : index
    %c0_59 = arith.constant 0 : index
    %70 = vector.load %arg7[%c1_57, %c0_58, %c0_59] : memref<3x128x128xbf16, #tpu.memory_space<vmem>>, vector<1x128x128xbf16>
    %71 = vector.shape_cast %70 : vector<1x128x128xbf16> to vector<128x128xbf16>
    %cst_60 = arith.constant dense<0.000000e+00> : vector<8x128xf32>
    %72 = tpu.matmul %69, %71, %cst_60 {dimension_numbers = #tpu.dot_dimension_numbers<[1], [0], [0], [1], [0, 0, 1, 1], [], []>} : vector<8x128xbf16>, vector<128x128xbf16>, vector<8x128xf32> -> vector<8x128xf32>
    %73 = arith.addf %67, %72 : vector<8x128xf32>
    %74 = vector.extract_strided_slice %60 {offsets = [9, 0], sizes = [8, 128], strides = [1, 1]} : vector<24x128xf32> to vector<8x128xf32>
    %75 = arith.truncf %74 : vector<8x128xf32> to vector<8x128xbf16>
    %c2_61 = arith.constant 2 : index
    %c0_62 = arith.constant 0 : index
    %c0_63 = arith.constant 0 : index
    %76 = vector.load %arg7[%c2_61, %c0_62, %c0_63] : memref<3x128x128xbf16, #tpu.memory_space<vmem>>, vector<1x128x128xbf16>
    %77 = vector.shape_cast %76 : vector<1x128x128xbf16> to vector<128x128xbf16>
    %cst_64 = arith.constant dense<0.000000e+00> : vector<8x128xf32>
    %78 = tpu.matmul %75, %77, %cst_64 {dimension_numbers = #tpu.dot_dimension_numbers<[1], [0], [0], [1], [0, 0, 1, 1], [], []>} : vector<8x128xbf16>, vector<128x128xbf16>, vector<8x128xf32> -> vector<8x128xf32>
    %79 = arith.addf %73, %78 : vector<8x128xf32>
    %c0_65 = arith.constant 0 : index
    %c0_66 = arith.constant 0 : index
    %80 = vector.load %arg8[%c0_65, %c0_66] : memref<1x128xf32, #tpu.memory_space<vmem>>, vector<1x128xf32>
    %81 = vector.broadcast %80 : vector<1x128xf32> to vector<8x128xf32>
    %82 = arith.mulf %79, %81 : vector<8x128xf32>
    %c0_67 = arith.constant 0 : index
    %c0_68 = arith.constant 0 : index
    %83 = vector.load %arg9[%c0_67, %c0_68] : memref<1x128xf32, #tpu.memory_space<vmem>>, vector<1x128xf32>
    %84 = vector.broadcast %83 : vector<1x128xf32> to vector<8x128xf32>
    %85 = arith.addf %82, %84 : vector<8x128xf32>
    %cst_69 = arith.constant 0.000000e+00 : f32
    %86 = vector.broadcast %cst_69 : f32 to vector<8x128xf32>
    %87 = arith.maximumf %85, %86 : vector<8x128xf32>
    %c0_70 = arith.constant 0 : index
    %c0_71 = arith.constant 0 : index
    %c0_72 = arith.constant 0 : index
    %88 = vector.load %arg10[%c0_70, %c0_71, %c0_72] : memref<1x8x128xf32, #tpu.memory_space<vmem>>, vector<1x8x128xf32>
    %89 = vector.shape_cast %88 : vector<1x8x128xf32> to vector<8x128xf32>
    %90 = vector.shape_cast %87 : vector<8x128xf32> to vector<1x8x128xf32>
    tpu.vector_store %arg10[%c0_70, %c0_71, %c0_72], %90 {strides = array<i32>} : memref<1x8x128xf32, #tpu.memory_space<vmem>>, vector<1x8x128xf32>,
    return
  }
  func.func @transform_0(%arg0: i32) -> (i32, i32, i32) {
    %c0_i32 = arith.constant 0 : i32
    %c0_i32_0 = arith.constant 0 : i32
    %c0_i32_1 = arith.constant 0 : i32
    return %arg0, %c0_i32, %c0_i32_0 : i32, i32, i32
  }
  func.func @transform_1(%arg0: i32) -> (i32, i32, i32) {
    %c0_i32 = arith.constant 0 : i32
    %c0_i32_0 = arith.constant 0 : i32
    %c0_i32_1 = arith.constant 0 : i32
    return %arg0, %c0_i32, %c0_i32_0 : i32, i32, i32
  }
  func.func @transform_2(%arg0: i32) -> (i32, i32, i32) {
    %c0_i32 = arith.constant 0 : i32
    %c0_i32_0 = arith.constant 0 : i32
    %c0_i32_1 = arith.constant 0 : i32
    %c0_i32_2 = arith.constant 0 : i32
    return %c0_i32, %c0_i32_0, %c0_i32_1 : i32, i32, i32
  }
  func.func @transform_3(%arg0: i32) -> (i32, i32, i32) {
    %c0_i32 = arith.constant 0 : i32
    %c0_i32_0 = arith.constant 0 : i32
    %c0_i32_1 = arith.constant 0 : i32
    %c0_i32_2 = arith.constant 0 : i32
    return %c0_i32, %c0_i32_0, %c0_i32_1 : i32, i32, i32
  }
  func.func @transform_4(%arg0: i32) -> (i32, i32) {
    %c0_i32 = arith.constant 0 : i32
    %c0_i32_0 = arith.constant 0 : i32
    %c0_i32_1 = arith.constant 0 : i32
    return %c0_i32, %c0_i32_0 : i32, i32
  }
  func.func @transform_5(%arg0: i32) -> (i32, i32) {
    %c0_i32 = arith.constant 0 : i32
    %c0_i32_0 = arith.constant 0 : i32
    %c0_i32_1 = arith.constant 0 : i32
    return %c0_i32, %c0_i32_0 : i32, i32
  }
  func.func @transform_6(%arg0: i32) -> (i32, i32, i32) {
    %c0_i32 = arith.constant 0 : i32
    %c0_i32_0 = arith.constant 0 : i32
    %c0_i32_1 = arith.constant 0 : i32
    %c0_i32_2 = arith.constant 0 : i32
    return %c0_i32, %c0_i32_0, %c0_i32_1 : i32, i32, i32
  }
  func.func @transform_7(%arg0: i32) -> (i32, i32) {
    %c0_i32 = arith.constant 0 : i32
    %c0_i32_0 = arith.constant 0 : i32
    %c0_i32_1 = arith.constant 0 : i32
    return %c0_i32, %c0_i32_0 : i32, i32
  }
  func.func @transform_8(%arg0: i32) -> (i32, i32) {
    %c0_i32 = arith.constant 0 : i32
    %c0_i32_0 = arith.constant 0 : i32
    %c0_i32_1 = arith.constant 0 : i32
    return %c0_i32, %c0_i32_0 : i32, i32
  }
  func.func @transform_9(%arg0: i32) -> (i32, i32, i32) {
    %c0_i32 = arith.constant 0 : i32
    %c0_i32_0 = arith.constant 0 : i32
    %c0_i32_1 = arith.constant 0 : i32
    return %arg0, %c0_i32, %c0_i32_0 : i32, i32, i32
  }
}

</mosaic_0001>

<bundles_post_ra>
// kernel: tpu_custom_call.1
= control target key start
LH: loop header
LB: loop body
LE: loop exit
PB: predicated region body
PF: predicated region fallthrough
CT: control target
= control target key end

     0   :  { %s2760_s0 = inlined_call_operand.hbm [shape: f32[2,8,256], index: 0, kind: input, shape index: {}]   ;;  %s2761_s1 = inlined_call_operand.hbm [shape: f32[2,8,128], index: 1, kind: input, shape index: {}]   ;;  %s2762_s2 = inlined_call_operand.hbm [shape: bf16[3,256,128], index: 2, kind: input, shape index: {}]   ;;  %s2763_s3 = inlined_call_operand.hbm [shape: bf16[3,128,128], index: 3, kind: input, shape index: {}]   ;;  %s2764_s4 = inlined_call_operand.vmem [shape: f32[1,128], index: 4, kind: input, shape index: {}]   ;;  %s2765_s5 = inlined_call_operand.vmem [shape: f32[1,128], index: 5, kind: input, shape index: {}]   ;;  %s2766_s6 = inlined_call_operand.hbm [shape: bf16[3,128,128], index: 6, kind: input, shape index: {}]   ;;  %s2767_s7 = inlined_call_operand.vmem [shape: f32[1,128], index: 7, kind: input, shape index: {}]   ;;  %s2768_s8 = inlined_call_operand.vmem [shape: f32[1,128], index: 8, kind: input, shape index: {}]   ;;  %s2769_s9 = inlined_call_operand.hbm [shape: f32[2,8,128], index: 9, kind: output, shape index: {}]  }
   0x1   :  { %2775 = sst [smem:[#allocation25_spill]] %s2762_s2 }
   0x2   :  { %2776 = sst [smem:[#allocation26_spill]] %s2763_s3 }
   0x3   :  { %2777 = sst [smem:[#allocation27_spill]] %s2766_s6 }
   0x4   :  { %14 = vsyncpa [#allocation6], 0 }
   0x5   :  { %16 = vsyncpa [#allocation6 + $0x1], 0 }
   0x6   :  { %17 = vsyncpa [#allocation9], 0 }
   0x7   :  { %19 = vsyncpa [#allocation9 + $0x1], 0 }
   0x8   :  { %20 = vsyncpa [#allocation12], 0 }
   0x9   :  { %21 = vsyncpa [#allocation7], 0 }
   0xa   :  { %23 = vsyncpa [#allocation7 + $0x1], 0  ;;  %s2523_s30 = smov 0   ;;  %s2525_s10 = smov 0  }
   0xb   :  { %s2527_s11 = smov 0   ;;  %s2529_s12 = smov 0  }
   0xc LB: > { %2778 = sst [smem:[#allocation20_spill]] %s2453_s30  ;;  %s2547_s16 = sadd.s32 4294967295, %s2465_s12   ;;  %s2465_s12 = sphi %s2529_s12, %s2796_s12   ;;  %s2461_s11 = sphi %s2527_s11, %s2798_s11   ;;  %s2457_s10 = sphi %s2525_s10, %s2800_s10   ;;  %s2453_s30 = sphi %s2523_s30, %s2799_s30  }
   0xd   : > { %2779 = sst [smem:[#allocation21_spill]] %s2461_s11  ;;  %p1646_p0 = scmp.ge.s32.totalorder %s2465_s12, 1 }
   0xe   : > { %s2780_s2 = sld [smem:[#allocation25_spill]]  ;;  %p50_p1 = scmp.eq.s32.totalorder %s2547_s16, 0 }
   0xf   : > { %p259_p2 = scmp.lt.s32.totalorder %s2465_s12, 3  ;;  %s2467_s18 = smov [#allocation10]  }
  0x10   : > { %s272_s19 = sshll.u32 %s2467_s18, 4  ;;  %s2782_s3 = sld [smem:[#allocation26_spill]]  ;;  %s273_s19 = int_to_ptr.vmem [resolvable:$true] %s272_s19 }
  0x11   : > { %p2552_p3 = pnand %p1646_p0, %p259_p2  ;;  %s2784_s6 = sld [smem:[#allocation27_spill]] }
  0x12   : > { %s2468_s27 = smov [#allocation11]   ;;  %s2469_s29 = smov 64  }
  0x13   : > { %p2166_p4 = pneg %p2552_p3  ;;  %s286_s28 = sshll.u32 %s2468_s27, 4  ;;  %s287_s28 = int_to_ptr.vmem [resolvable:$true] %s286_s28 }
  0x14   : > { %s270_s15 = sshll.u32 %s2780_s2, 4  ;;  %s2470_s13 = smov 4   ;;  %s271_s15 = int_to_ptr.hbm [resolvable:$true] %s270_s15 }
  0x15   : > { %p2564_p6 = pnand %p2166_p4, %p50_p1  ;;  %s2471_s14 = smov [#allocation13]  }
  0x16   : > { %s284_s22 = sshll.u32 %s2782_s3, 4  ;;  %s306_s18 = sshll.u32 %s2471_s14, 4  ;;  %s285_s22 = int_to_ptr.hbm [resolvable:$true] %s284_s22  ;;  %s307_s18 = int_to_ptr.vmem [resolvable:$true] %s306_s18 }
  0x17   : > { %s304_s26 = sshll.u32 %s2784_s6, 4  ;;  %s1645_s20 = sadd.s32 4294967294, %s2465_s12   ;;  %s305_s26 = int_to_ptr.hbm [resolvable:$true] %s304_s26 }
  0x18   : > { %2169 = dma.hbm_to_vmem [thread:$0]  (!%p2564_p6), %s271_s15, 6144, %s273_s19, [#allocation9], %s2469_s29, %s2469_s29, %s2470_s13  }
  0x19   : > { %2172 = dma.hbm_to_vmem [thread:$0]  (!%p2564_p6), %s285_s22, 3072, %s287_s28, [#allocation12], %s2469_s29, %s2469_s29, %s2470_s13  }
  0x1a   : > { %2175 = dma.hbm_to_vmem [thread:$0]  (!%p2564_p6), %s305_s26, 3072, %s307_s18, [#allocation12], %s2469_s29, %s2469_s29, %s2470_s13  }
  0x1b   : > { %s2579_s21 = sadd.s32 1, %s2465_s12   ;;  %s36_s24 = sadd.s32 1, %s2461_s11 }
  0x1c   : > { %2785 = sst [smem:[#allocation22_spill]] %s2579_s21  ;;  %s33_s15 = ssub.s32 %s2465_s12, %s2579_s21 }
  0x1d   : > { %p43_p7 = scmp.ne.s32.totalorder %s2461_s11, %s2457_s10  ;;  %p34_p8 = scmp.eq.s32.totalorder %s33_s15, 0 }
  0x1e   : > { %p44_p9 = scmp.eq.s32.totalorder %s2465_s12, 0  ;;  %p49_p10 = scmp.ne.s32.totalorder %s2457_s10, %s2453_s30 }
  0x1f   : > { %p246_p11 = scmp.eq.s32.totalorder %s2547_s16, 1  ;;  %p252_p2 = scmp.eq.s32.totalorder %s1645_s20, 1 }
  0x20   : > { %s2591_s19 = scalar_select %p34_p8, %s2461_s11, %s36_s24  }
  0x21   : > { %p2593_p12 = por %p44_p9, %p43_p7  ;;  %p2599_p13 = por %p50_p1, %p49_p10 }
  0x22   : > { %2786 = sst [smem:[#allocation23_spill]] %s2591_s19  ;;  %p2603_p0 = por %p246_p11, %p43_p7 }
  0x23   : > { %p2190_p4 = scmp.lt.s32.totalorder %s2465_s12, 2  ;;  %s2609_s26 = sand.u32 1, %s2461_s11  }
  0x24   : > { %p2611_p6 = por %p252_p2, %p49_p10  ;;  %s1651_s28 = sshll.u32 %s2609_s26, 4 }
  0x25   : > { %s2051_s29 = sshll.u32 %s2465_s12, 4  ;;  %s330_s15 = scalar_lea.vmem [#allocation5], %s1651_s28 }
  0x26   : > { %s2790_s27 = scalar_select %p2611_p6, 1, 0 }
  0x27   : > { %s335_s18 = scalar_lea.hbm %s2760_s0, %s2051_s29  ;;  %s339_s2 = sshll.u32 %s330_s15, 4  ;;  %s340_s2 = int_to_ptr.vmem [resolvable:$true] %s339_s2 }
  0x28   : > { %2791 = sst [smem:[#allocation24_spill]] %s2790_s27  ;;  %s337_s24 = sshll.u32 %s335_s18, 4  ;;  %s338_s24 = int_to_ptr.hbm [resolvable:$true] %s337_s24 }
  0x29   : > { %p2622_p7 = pnand %p2190_p4, %p2593_p12  ;;  %s346_s3 = sand.u32 1, %s2465_s12  }
  0x2a   : > { %s1654_s6 = sshll.u32 %s2609_s26, 3  ;;  %s327_s19 = scalar_lea.sflag [#allocation6], %s2609_s26 }
  0x2b   : > { %s2327_s11 = sshra.s32 %s338_s24, 4  ;;  %p2331_p9 = pneg %p2622_p7  ;;  %s2328_s11 = int_to_ptr.hbm [resolvable:$true] %s2327_s11 }
  0x2c   : > { %s2329_s21 = scalar_lea.hbm %s2328_s11, 16  ;;  %s2334_s29 = scalar_lea.hbm %s2760_s0, 32 }
  0x2d   : > { %p2330_p8 = scmp.ne.s32.totalorder %s2328_s11, %s2329_s21  ;;  %p2335_p12 = scmp.lt.s32.totalorder %s2328_s11, %s2760_s0 }
  0x2e   : > { %p2336_p2 = scmp.lt.s32.totalorder %s2334_s29, %s2329_s21 }
  0x2f   : > { %p2332_p10 = pnand %p2331_p9, %p2330_p8 }
  0x30   : > { %p2337_p4 = por %p2336_p2, %p2335_p12 }
  0x31   : > { %p2333_p11 = pneg %p2332_p10 }
  0x33   : > { %p2338_p5 = pnand %p2337_p4, %p2333_p11 }
  0x35   : > { %2341 = shalt.err (!%p2338_p5)
}
  0x36   : > { %2179 = dma.hbm_to_vmem [thread:$0]  (!%p2622_p7), %s338_s24, 256, %s340_s2, %s327_s19  }
  0x37   : > { %s1655_s26 = sshll.u32 %s2465_s12, 3  ;;  %s350_s18 = scalar_lea.vmem [#allocation8], %s1654_s6 }
  0x38   : > { %s358_s15 = sshll.u32 %s350_s18, 4  ;;  %s354_s22 = scalar_lea.hbm %s2761_s1, %s1655_s26  ;;  %s359_s15 = int_to_ptr.vmem [resolvable:$true] %s358_s15 }
  0x39   : > { %s356_s28 = sshll.u32 %s354_s22, 4  ;;  %s347_s11 = scalar_lea.sflag [#allocation9], %s346_s3  ;;  %s357_s28 = int_to_ptr.hbm [resolvable:$true] %s356_s28 }
  0x3a   : > { %s2357_s21 = sshra.s32 %s357_s28, 4  ;;  %s2364_s6 = scalar_lea.hbm %s2761_s1, 16  ;;  %s2358_s21 = int_to_ptr.hbm [resolvable:$true] %s2357_s21 }
  0x3b   : > { %s2359_s29 = scalar_lea.hbm %s2358_s21, 8  ;;  %p2365_p11 = scmp.lt.s32.totalorder %s2358_s21, %s2761_s1 }
  0x3c   : > { %p2360_p5 = scmp.ne.s32.totalorder %s2358_s21, %s2359_s29  ;;  %p2366_p12 = scmp.lt.s32.totalorder %s2364_s6, %s2359_s29 }
  0x3e   : > { %p2362_p8 = pnand %p2360_p5, %p2331_p9  ;;  %p2367_p2 = por %p2366_p12, %p2365_p11 }
  0x40   : > { %p2363_p10 = pneg %p2362_p8 }
  0x42   : > { %p2368_p4 = pnand %p2367_p2, %p2363_p10 }
  0x44   : > { %2371 = shalt.err (!%p2368_p4)
}
  0x45   : > { %2182 = dma.hbm_to_vmem [thread:$0]  (!%p2622_p7), %s357_s28, 128, %s359_s15, %s347_s11  }
  0x46   : > { %367 = sbr.rel (%p2552_p3) target bundleno = 466 (0x1d2), region = 56  ;;  %s2660_s3 = sand.u32 (!%p2552_p3), 1, %s2457_s10  }
  0x47   : > { %s1657_s30 = sshll.u32 (!%p2552_p3), %s2660_s3, 4  ;;  %s370_s27 = scalar_lea.sflag (!%p2552_p3), [#allocation6], %s2660_s3 }
  0x48   : > { %s2664_s14 = scalar_lea.vmem (!%p2552_p3), [#allocation5], %s1657_s30 }
  0x4b   : > { %2432 = dma.done.wait (%p2599_p13), %s370_s27, 256  }
  0x4c   : > { %2434 = vsyncadd (%p2599_p13), %s370_s27, 4294967040  ;;  %s379_s17 = sand.u32 1, %s2547_s16   ;;  %s1658_s20 = sshll.u32 %s2660_s3, 3 }
  0x4d   : > { %s380_s26 = scalar_lea.sflag [#allocation9], %s379_s17  ;;  %s2674_s18 = scalar_lea.vmem [#allocation8], %s1658_s20 }
  0x4e   : > { %2436 = dma.done.wait (%p2599_p13), %s380_s26, 128  }
  0x4f   : > { %2438 = vsyncadd (%p2599_p13), %s380_s26, 4294967168 }
  0x50   : > { %2440 = dma.done.wait (%p50_p1), [#allocation9], 6144  }
  0x51   : > { %2442 = vsyncadd (%p50_p1), [#allocation9], 4294961152 }
  0x52   : > { %2444 = dma.done.wait (%p50_p1), [#allocation12], 6144  }
  0x53   : > { %2446 = vsyncadd (%p50_p1), [#allocation12], 4294961152  ;;  %v2075_v0 = vld [vmem:[#allocation11 + $0x38] sm:$0xff]  ;;  %v2074_v4 = vld [vmem:[#allocation11 + $0x30] sm:$0xff]  ;;  %v2472_v22 = vmov 0.0   ;;  %s2048_s11 = sshll.u32 %s2547_s16, 3 }
  0x54   : > { %v2067_v1 = vld [vmem:[#allocation10 + $0x78] sm:$0xff]  ;;  %571 = vmatpush.bf16.msra.mxu0 %v2075_v0  ;;  %v2066_v5 = vld [vmem:[#allocation10 + $0x70] sm:$0xff]  ;;  %v2073_v8 = vld [vmem:[#allocation11 + $0x28] sm:$0xff]  ;;  %s1519_s13 = scalar_lea.hbm %s2769_s9, %s2048_s11  ;;  %s438_s30 = scalar_lea.vmem [#allocation14], %s1658_s20 }
  0x55   : > { %v2083_v2 = vld [vmem:[#allocation10 + $0xb8] sm:$0xff]  ;;  %711 = vmatpush.bf16.msra.mxu2 %v2067_v1  ;;  %v2082_v6 = vld [vmem:[#allocation10 + $0xb0] sm:$0xff]  ;;  %v2065_v9 = vld [vmem:[#allocation10 + $0x68] sm:$0xff]  ;;  %s1521_s16 = sshll.u32 %s438_s30, 4  ;;  %s1523_s27 = sshll.u32 %s1519_s13, 4  ;;  %s1522_s16 = int_to_ptr.vmem [resolvable:$true] %s1521_s16  ;;  %s1524_s27 = int_to_ptr.hbm [resolvable:$true] %s1523_s27 }
  0x56   : > { %v2059_v3 = vld [vmem:[#allocation10 + $0x38] sm:$0xff]  ;;  %855 = vmatpush.bf16.msra.mxu3 %v2083_v2  ;;  %v2058_v7 = vld [vmem:[#allocation10 + $0x30] sm:$0xff]  ;;  %v2081_v10 = vld [vmem:[#allocation10 + $0xa8] sm:$0xff]  ;;  %s2401_s17 = sshra.s32 %s1524_s27, 4  ;;  %s2407_s20 = scalar_lea.hbm %s2769_s9, 16  ;;  %s2402_s17 = int_to_ptr.hbm [resolvable:$true] %s2401_s17 }
  0x57   : > { %698 = vmatpush.bf16.msra.mxu1 %v2059_v3  ;;  %v2057_v11 = vld [vmem:[#allocation10 + $0x28] sm:$0xff]  ;;  %v2072_v12 = vld [vmem:[#allocation11 + $0x20] sm:$0xff]  ;;  %v2071_v16 = vld [vmem:[#allocation11 + $0x18] sm:$0xff]  ;;  %s2403_s26 = scalar_lea.hbm %s2402_s17, 8  ;;  %p2408_p7 = scmp.lt.s32.totalorder %s2402_s17, %s2769_s9 }
  0x58   : > { %572 = vmatpush.bf16.msra.mxu0 %v2074_v4  ;;  %v2064_v13 = vld [vmem:[#allocation10 + $0x60] sm:$0xff]  ;;  %v2063_v17 = vld [vmem:[#allocation10 + $0x58] sm:$0xff]  ;;  %v2070_v24 = vld [vmem:[#allocation11 + $0x10] sm:$0xff]  ;;  %p2404_p1 = scmp.ne.s32.totalorder %s2402_s17, %s2403_s26  ;;  %p2409_p9 = scmp.lt.s32.totalorder %s2407_s20, %s2403_s26 }
  0x59   : > { %712 = vmatpush.bf16.msra.mxu2 %v2066_v5  ;;  %v2080_v14 = vld [vmem:[#allocation10 + $0xa0] sm:$0xff]  ;;  %v2079_v18 = vld [vmem:[#allocation10 + $0x98] sm:$0xff]  ;;  %v2062_v25 = vld [vmem:[#allocation10 + $0x50] sm:$0xff] }
  0x5a   : > { %856 = vmatpush.bf16.msra.mxu3 %v2082_v6  ;;  %v2056_v15 = vld [vmem:[#allocation10 + $0x20] sm:$0xff]  ;;  %v2055_v19 = vld [vmem:[#allocation10 + $0x18] sm:$0xff]  ;;  %v2078_v28 = vld [vmem:[#allocation10 + $0x90] sm:$0xff]  ;;  %p2405_p3 = pnand %p2404_p1, %p2603_p0  ;;  %p2410_p5 = por %p2409_p9, %p2408_p7 }
  0x5b   : > { %699 = vmatpush.bf16.msra.mxu1 %v2058_v7  ;;  %v2689_v20 = vld [vmem:[%s2674_s18] sm:$0xff]  ;;  %v2692_v21 = vld [vmem:[%s2664_s14 + $0x8] sm:$0xff]  ;;  %v2068_v43 = vld [vmem:[#allocation11] sm:$0xff] }
  0x5c   : > { %573 = vmatpush.bf16.msra.mxu0 %v2073_v8  ;;  %v497_v23 = vpack.c.bf16 %v2689_v20, %v2472_v22  ;;  %v464_v26 = vpack.c.bf16 %v2692_v21, %v2472_v22  ;;  %v2699_v27 = vld [vmem:[%s2664_s14] sm:$0xff]  ;;  %v2069_v33 = vld [vmem:[#allocation11 + $0x8] sm:$0xff]  ;;  %v2091_v48 = vld [vmem:[#allocation10 + $0xf8] sm:$0xff]  ;;  %s1509_s14 = scalar_lea.sflag [#allocation7], %s2660_s3  ;;  %p2406_p13 = pneg %p2405_p3 }
  0x5d   : > { %713 = vmatpush.bf16.msra.mxu2 %v2065_v9  ;;  %v2054_v29 = vld [vmem:[#allocation10 + $0x10] sm:$0xff]  ;;  %v463_v32 = vpack.c.bf16 %v2699_v27, %v2472_v22  ;;  %v2061_v34 = vld [vmem:[#allocation10 + $0x48] sm:$0xff]  ;;  %v2060_v44 = vld [vmem:[#allocation10 + $0x40] sm:$0xff]  ;;  %v724_v58 = vpack.c.bf16 %v2699_v27, %v2699_v27 }
  0x5e   : > { %857 = vmatpush.bf16.msra.mxu3 %v2081_v10  ;;  %v515_v30 = vshrl.u32 %v497_v23, 16  ;;  %v518_v31 = vshll.u32 %v497_v23, 16  ;;  %v2077_v35 = vld [vmem:[#allocation10 + $0x88] sm:$0xff]  ;;  %v593_v36 = vshrl.u32 %v464_v26, 16  ;;  %v596_v37 = vshll.u32 %v464_v26, 16  ;;  %v2076_v47 = vld [vmem:[#allocation10 + $0x80] sm:$0xff]  ;;  %p2411_p8 = pnand %p2410_p5, %p2406_p13 }
  0x5f   : > { %700 = vmatpush.bf16.msra.mxu1 %v2057_v11  ;;  %v2053_v38 = vld [vmem:[#allocation10 + $0x8] sm:$0xff]  ;;  %v585_v41 = vshrl.u32 %v463_v32, 16  ;;  %v588_v42 = vshll.u32 %v463_v32, 16  ;;  %v2107_v49 = vld [vmem:[#allocation10 + $0x138] sm:$0xff]  ;;  %v2052_v51 = vld [vmem:[#allocation10] sm:$0xff]  ;;  %v962_v11 = vpack.c.bf16 0.0, %v2699_v27 }
  0x60   : > { %574 = vmatpush.bf16.msra.mxu0 %v2072_v12  ;;  %v517_v39 = vrot.slane %v515_v30, 3  ;;  %v520_v40 = vrot.slane %v518_v31, 4  ;;  %v595_v45 = vrot.slane %v593_v36, 3  ;;  %v598_v46 = vrot.slane %v596_v37, 4  ;;  %v2115_v50 = vld [vmem:[#allocation10 + $0x178] sm:$0xff]  ;;  %v2090_v57 = vld [vmem:[#allocation10 + $0xf0] sm:$0xff] }
  0x61   : > { %714 = vmatpush.bf16.msra.mxu2 %v2064_v13  ;;  %v587_v53 = vrot.slane %v585_v41, 3  ;;  %v590_v54 = vrot.slane %v588_v42, 4  ;;  %v2099_v55 = vld [vmem:[#allocation11 + $0x78] sm:$0xff]  ;;  %v2106_v59 = vld [vmem:[#allocation10 + $0x130] sm:$0xff]  ;;  %v2089_v63 = vld [vmem:[#allocation10 + $0xe8] sm:$0xff]  ;;  %v963_v13 = vpack.c.bf16 0.0, %v2692_v21 }
  0x62   : > { %858 = vmatpush.bf16.msra.mxu3 %v2080_v14  ;;  %v521_v52 = vor.u32 %v520_v40, %v517_v39  ;;  %v599_v56 = vor.u32 %v598_v46, %v595_v45  ;;  %v2114_v60 = vld [vmem:[#allocation10 + $0x170] sm:$0xff]  ;;  %v2105_v0 = vld [vmem:[#allocation10 + $0x128] sm:$0xff]  ;;  %v2088_v3 = vld [vmem:[#allocation10 + $0xe0] sm:$0xff]  ;;  %v998_v27 = vshrl.u32 %v962_v11, 16  ;;  %v882_v39 = vpack.c.bf16 %v2689_v20, %v2689_v20 }
  0x63   : > { %701 = vmatpush.bf16.msra.mxu1 %v2056_v15  ;;  %v591_v61 = vor.u32 %v590_v54, %v587_v53  ;;  %v2098_v62 = vld [vmem:[#allocation11 + $0x70] sm:$0xff]  ;;  %v2113_v1 = vld [vmem:[#allocation10 + $0x168] sm:$0xff]  ;;  %v2104_v4 = vld [vmem:[#allocation10 + $0x120] sm:$0xff]  ;;  %v1136_v42 = vpack.c.bf16 0.0, %v2689_v20 }
  0x64   : > { %575 = vmatpush.bf16.msra.mxu0 %v2071_v16  ;;  %v2097_v2 = vld [vmem:[#allocation11 + $0x68] sm:$0xff]  ;;  %v2112_v5 = vld [vmem:[#allocation10 + $0x160] sm:$0xff]  ;;  %v2087_v7 = vld [vmem:[#allocation10 + $0xd8] sm:$0xff] }
  0x65   : > { %715 = vmatpush.bf16.msra.mxu2 %v2063_v17  ;;  %v2096_v6 = vld [vmem:[#allocation11 + $0x60] sm:$0xff]  ;;  %v2103_v8 = vld [vmem:[#allocation10 + $0x118] sm:$0xff]  ;;  %v2086_v12 = vld [vmem:[#allocation10 + $0xd0] sm:$0xff]  ;;  %v1155_v46 = vshrl.u32 %v1136_v42, 16 }
  0x66   : > { %859 = vmatpush.bf16.msra.mxu3 %v2079_v18  ;;  %v2111_v9 = vld [vmem:[#allocation10 + $0x158] sm:$0xff]  ;;  %v2102_v14 = vld [vmem:[#allocation10 + $0x110] sm:$0xff]  ;;  %v2085_v17 = vld [vmem:[#allocation10 + $0xc8] sm:$0xff]  ;;  %v1000_v18 = vshll.u32 %v962_v11, 16 }
  0x67   : > { %702 = vmatpush.bf16.msra.mxu1 %v2055_v19  ;;  %v2095_v10 = vld [vmem:[#allocation11 + $0x58] sm:$0xff]  ;;  %v2110_v15 = vld [vmem:[#allocation10 + $0x150] sm:$0xff]  ;;  %v1007_v19 = vshll.u32 %v963_v13, 16  ;;  %v2101_v23 = vld [vmem:[#allocation10 + $0x108] sm:$0xff] }
  0x68   : > { %576 = vmatpush.bf16.msra.mxu0 %v2070_v24  ;;  %v2094_v16 = vld [vmem:[#allocation11 + $0x50] sm:$0xff]  ;;  %v2109_v24 = vld [vmem:[#allocation10 + $0x148] sm:$0xff]  ;;  %v2084_v26 = vld [vmem:[#allocation10 + $0xc0] sm:$0xff] }
  0x69   : > { %716 = vmatpush.bf16.msra.mxu2 %v2062_v25  ;;  %v2093_v25 = vld [vmem:[#allocation11 + $0x48] sm:$0xff]  ;;  %v1009_v30 = vrot.slane %v1007_v19, 1  ;;  %v2100_v31 = vld [vmem:[#allocation10 + $0x100] sm:$0xff]  ;;  %v2119_v41 = vld [vmem:[#allocation11 + $0x98] sm:$0xff] }
  0x6a   : > { %860 = vmatpush.bf16.msra.mxu3 %v2078_v28  ;;  %v1002_v28 = vrot.slane %v1000_v18, 1  ;;  %v2108_v32 = vld [vmem:[#allocation10 + $0x140] sm:$0xff]  ;;  %v2121_v40 = vld [vmem:[#allocation11 + $0xa8] sm:$0xff]  ;;  %v2131_v53 = vld [vmem:[#allocation13 + $0x38] sm:$0xff] }
  0x6b   : > { %703 = vmatpush.bf16.msra.mxu1 %v2054_v29  ;;  %v1005_v29 = vshrl.u32 %v963_v13, 16  ;;  %v2117_v45 = vld [vmem:[#allocation11 + $0x88] sm:$0xff]  ;;  %v2147_v54 = vld [vmem:[#allocation13 + $0xb8] sm:$0xff]  ;;  %v2138_v20 = vld [vmem:[#allocation13 + $0x70] sm:$0xff] }
  0x6c   : > { %577 = vmatpush.bf16.msra.mxu0 %v2069_v33  ;;  %v2123_v33 = vld [vmem:[#allocation11 + $0xb8] sm:$0xff]  ;;  %v1003_v36 = vor.u32 %v1002_v28, %v998_v27  ;;  %v2126_v11 = vld [vmem:[#allocation13 + $0x10] sm:$0xff] }
  0x6d   : > { %717 = vmatpush.bf16.msra.mxu2 %v2061_v34  ;;  %v725_v34 = vpack.c.bf16 %v2692_v21, %v2692_v21  ;;  %v1010_v37 = vor.u32 %v1009_v30, %v1005_v29  ;;  %v2120_v21 = vld [vmem:[#allocation11 + $0xa0] sm:$0xff] }
  0x6e   : > { %861 = vmatpush.bf16.msra.mxu3 %v2077_v35  ;;  %v2092_v35 = vld [vmem:[#allocation11 + $0x40] sm:$0xff] }
  0x6f   : > { %704 = vmatpush.bf16.msra.mxu1 %v2053_v38  ;;  %v2122_v38 = vld [vmem:[#allocation11 + $0xb0] sm:$0xff] }
  0x70   : > { %578 = vmatpush.bf16.msra.mxu0 %v2068_v43  ;;  %v2118_v43 = vld [vmem:[#allocation11 + $0x90] sm:$0xff] }
  0x71   : > { %718 = vmatpush.bf16.msra.mxu2 %v2060_v44  ;;  %v1157_v44 = vshll.u32 %v1136_v42, 16 }
  0x72   : > { %862 = vmatpush.bf16.msra.mxu3 %v2076_v47 }
  0x73   : > { %705 = vmatpush.bf16.msra.mxu1 %v2052_v51  ;;  %579 = vmatmul.bf16.vlgmr.msra.gmra.mxu0 %v521_v52  ;;  %v1159_v47 = vrot.slane %v1157_v44, 1  ;;  %v2139_v52 = vld [vmem:[#allocation13 + $0x78] sm:$0xff] }
  0x74   : > { %868 = vmatpush.bf16.msrb.mxu0 %v2091_v48  ;;  %719 = vmatmul.bf16.vlgmr.msra.gmra.mxu2 %v599_v56  ;;  %v2116_v48 = vld [vmem:[#allocation11 + $0x80] sm:$0xff]  ;;  %v2130_v56 = vld [vmem:[#allocation13 + $0x30] sm:$0xff] }
  0x75   : > { %1109 = vmatpush.bf16.msrb.mxu2 %v2107_v49  ;;  %863 = vmatmul.bf16.vlgmr.msra.gmra.mxu3 %v724_v58  ;;  %v1160_v49 = vor.u32 %v1159_v47, %v1155_v46 }
  0x76   : > { %1122 = vmatpush.bf16.msrb.mxu3 %v2115_v50  ;;  %706 = vmatmul.bf16.vlgmr.msra.gmra.mxu1 %v591_v61  ;;  %v2129_v61 = vld [vmem:[#allocation13 + $0x28] sm:$0xff] }
  0x77   : > { %948 = vmatpush.bf16.msrb.mxu1 %v2099_v55 }
  0x78   : > { %869 = vmatpush.bf16.msrb.mxu0 %v2090_v57 }
  0x79   : > { %1110 = vmatpush.bf16.msrb.mxu2 %v2106_v59  ;;  %v2146_v59 = vld [vmem:[#allocation13 + $0xb0] sm:$0xff] }
  0x7a   : > { %1123 = vmatpush.bf16.msrb.mxu3 %v2114_v60  ;;  %v2137_v60 = vld [vmem:[#allocation13 + $0x68] sm:$0xff] }
  0x7b   : > { %949 = vmatpush.bf16.msrb.mxu1 %v2098_v62 }
  0x7c   : > { %870 = vmatpush.bf16.msrb.mxu0 %v2089_v63  ;;  %v2145_v63 = vld [vmem:[#allocation13 + $0xa8] sm:$0xff] }
  0x7d   : > { %1111 = vmatpush.bf16.msrb.mxu2 %v2105_v0 }
  0x7e   : > { %1124 = vmatpush.bf16.msrb.mxu3 %v2113_v1  ;;  %v2136_v1 = vld [vmem:[#allocation13 + $0x60] sm:$0xff] }
  0x7f   : > { %950 = vmatpush.bf16.msrb.mxu1 %v2097_v2  ;;  %v2128_v2 = vld [vmem:[#allocation13 + $0x20] sm:$0xff] }
  0x80   : > { %871 = vmatpush.bf16.msrb.mxu0 %v2088_v3 }
  0x81   : > { %1112 = vmatpush.bf16.msrb.mxu2 %v2104_v4  ;;  %v2144_v4 = vld [vmem:[#allocation13 + $0xa0] sm:$0xff] }
  0x82   : > { %1125 = vmatpush.bf16.msrb.mxu3 %v2112_v5  ;;  %v2135_v5 = vld [vmem:[#allocation13 + $0x58] sm:$0xff] }
  0x83   : > { %951 = vmatpush.bf16.msrb.mxu1 %v2096_v6  ;;  %v2134_v6 = vld [vmem:[#allocation13 + $0x50] sm:$0xff] }
  0x84   : > { %872 = vmatpush.bf16.msrb.mxu0 %v2087_v7  ;;  %v2127_v7 = vld [vmem:[#allocation13 + $0x18] sm:$0xff] }
  0x85   : > { %1113 = vmatpush.bf16.msrb.mxu2 %v2103_v8  ;;  %v2143_v8 = vld [vmem:[#allocation13 + $0x98] sm:$0xff] }
  0x86   : > { %1126 = vmatpush.bf16.msrb.mxu3 %v2111_v9 }
  0x87   : > { %952 = vmatpush.bf16.msrb.mxu1 %v2095_v10  ;;  %v2133_v10 = vld [vmem:[#allocation13 + $0x48] sm:$0xff] }
  0x88   : > { %873 = vmatpush.bf16.msrb.mxu0 %v2086_v12  ;;  %v2142_v12 = vld [vmem:[#allocation13 + $0x90] sm:$0xff] }
  0x89   : > { %1114 = vmatpush.bf16.msrb.mxu2 %v2102_v14  ;;  %v2132_v14 = vld [vmem:[#allocation13 + $0x40] sm:$0xff] }
  0x8a   : > { %1127 = vmatpush.bf16.msrb.mxu3 %v2110_v15  ;;  %v2125_v15 = vld [vmem:[#allocation13 + $0x8] sm:$0xff] }
  0x8b   : > { %953 = vmatpush.bf16.msrb.mxu1 %v2094_v16  ;;  %v2141_v16 = vld [vmem:[#allocation13 + $0x88] sm:$0xff] }
  0x8c   : > { %874 = vmatpush.bf16.msrb.mxu0 %v2085_v17 }
  0x8d   : > { %1115 = vmatpush.bf16.msrb.mxu2 %v2101_v23  ;;  %v2124_v23 = vld [vmem:[#allocation13] sm:$0xff] }
  0x8e   : > { %1128 = vmatpush.bf16.msrb.mxu3 %v2109_v24  ;;  %v2140_v24 = vld [vmem:[#allocation13 + $0x80] sm:$0xff] }
  0x8f   : > { %954 = vmatpush.bf16.msrb.mxu1 %v2093_v25 }
  0x90   : > { %875 = vmatpush.bf16.msrb.mxu0 %v2084_v26 }
  0x91   : > { %1116 = vmatpush.bf16.msrb.mxu2 %v2100_v31 }
  0x92   : > { %1129 = vmatpush.bf16.msrb.mxu3 %v2108_v32 }
  0x93   : > { %876 = vmatmul.bf16.vlgmr.msrb.gmra.mxu0 %v725_v34  ;;  %955 = vmatpush.bf16.msrb.mxu1 %v2092_v35  ;;  %v2233_v35 = vld [vmem:[%s2764_s4] ss:$0 sm:$0xff] }
  0x94   : > { %1210 = vmatpush.bf16.msra.mxu0 %v2123_v33  ;;  %1117 = vmatmul.bf16.vlgmr.msrb.gmra.mxu2 %v1003_v36 }
  0x95   : > { %1130 = vmatmul.bf16.vlgmr.msrb.gmra.mxu3 %v1010_v37  ;;  %1395 = vmatpush.bf16.msra.mxu2 %v2131_v53 }
  0x96   : > { %956 = vmatmul.bf16.vlgmr.msrb.gmra.mxu1 %v882_v39  ;;  %1482 = vmatpush.bf16.msra.mxu3 %v2147_v54 }
  0x97   : > { %1325 = vmatpush.bf16.msra.mxu1 %v2139_v52 }
  0x98   : > { %1211 = vmatpush.bf16.msra.mxu0 %v2122_v38  ;;  %v2234_v38 = vld [vmem:[%s2765_s5] ss:$0 sm:$0xff] }
  0x99   : > { %1396 = vmatpush.bf16.msra.mxu2 %v2130_v56 }
  0x9a   : > { %1483 = vmatpush.bf16.msra.mxu3 %v2146_v59  ;;  %v2236_v59 = vld [vmem:[%s2768_s8] ss:$0 sm:$0xff] }
  0x9b   : > { %1326 = vmatpush.bf16.msra.mxu1 %v2138_v20 }
  0x9c   : > { %1212 = vmatpush.bf16.msra.mxu0 %v2121_v40 }
  0x9d   : > { %1397 = vmatpush.bf16.msra.mxu2 %v2129_v61 }
  0x9e   : > { %1484 = vmatpush.bf16.msra.mxu3 %v2145_v63 }
  0x9f   : > { %1327 = vmatpush.bf16.msra.mxu1 %v2137_v60 }
  0xa0   : > { %1213 = vmatpush.bf16.msra.mxu0 %v2120_v21 }
  0xa1   : > { %1398 = vmatpush.bf16.msra.mxu2 %v2128_v2 }
  0xa2   : > { %1485 = vmatpush.bf16.msra.mxu3 %v2144_v4 }
  0xa3   : > { %1328 = vmatpush.bf16.msra.mxu1 %v2136_v1 }
  0xa4   : > { %1214 = vmatpush.bf16.msra.mxu0 %v2119_v41 }
  0xa5   : > { %1399 = vmatpush.bf16.msra.mxu2 %v2127_v7 }
  0xa6   : > { %1486 = vmatpush.bf16.msra.mxu3 %v2143_v8 }
  0xa7   : > { %1329 = vmatpush.bf16.msra.mxu1 %v2135_v5 }
  0xa8   : > { %1215 = vmatpush.bf16.msra.mxu0 %v2118_v43 }
  0xa9   : > { %1400 = vmatpush.bf16.msra.mxu2 %v2126_v11 }
  0xaa   : > { %1487 = vmatpush.bf16.msra.mxu3 %v2142_v12 }
  0xab   : > { %1330 = vmatpush.bf16.msra.mxu1 %v2134_v6 }
  0xac   : > { %1216 = vmatpush.bf16.msra.mxu0 %v2117_v45 }
  0xad   : > { %1401 = vmatpush.bf16.msra.mxu2 %v2125_v15 }
  0xae   : > { %1488 = vmatpush.bf16.msra.mxu3 %v2141_v16 }
  0xaf   : > { %1331 = vmatpush.bf16.msra.mxu1 %v2133_v10 }
  0xb0   : > { %1217 = vmatpush.bf16.msra.mxu0 %v2116_v48 }
  0xb1   : > { %1402 = vmatpush.bf16.msra.mxu2 %v2124_v23 }
  0xb2   : > { %1489 = vmatpush.bf16.msra.mxu3 %v2140_v24 }
  0xb3   : > { %1218 = vmatmul.bf16.vlgmr.msra.gmra.mxu0 %v1160_v49  ;;  %1332 = vmatpush.bf16.msra.mxu1 %v2132_v14 }
  0xf0   : > { %v580_v50 = vpop.f32.mrf.mxu0 }
  0xf3   : > { %v707_v51 = vpop.f32.mrf.mxu1 }
  0xf4   : > { %v708_v26 = vadd.f32 %v707_v51, %v580_v50 }
  0xf7   : > { %v720_v55 = vpop.f32.mrf.mxu2 }
  0xf8   : > { %v864_v57 = vpop.f32.mrf.mxu3  ;;  %v582_v58 = vpop.f32.mrf.mxu0  ;;  %v721_v29 = vadd.f32 %v720_v55, %v708_v26 }
  0xfb   : > { %v709_v62 = vpop.f32.mrf.mxu1 }
  0xff   : > { %v722_v0 = vpop.f32.mrf.mxu2 }
 0x100   : > { %v866_v3 = vpop.f32.mrf.mxu3 }
 0x110   : > { %v877_v9 = vpop.f32.mrf.mxu0 }
 0x111   : > { %v878_v30 = vadd.f32 %v877_v9, %v864_v57  ;;  %v2235_v57 = vld [vmem:[%s2767_s7] ss:$0 sm:$0xff] }
 0x113   : > { %v957_v13 = vpop.f32.mrf.mxu1  ;;  %v881_v31 = vadd.f32 %v878_v30, %v721_v29 }
 0x115   : > { %v961_v33 = vadd.f32 %v957_v13, %v881_v31 }
 0x117   : > { %v1118_v17 = vpop.f32.mrf.mxu2 }
 0x118   : > { %v1131_v18 = vpop.f32.mrf.mxu3  ;;  %v879_v19 = vpop.f32.mrf.mxu0 }
 0x119   : > { %v1132_v32 = vadd.f32 %v1131_v18, %v1118_v17 }
 0x11b   : > { %v959_v25 = vpop.f32.mrf.mxu1  ;;  %v1135_v34 = vadd.f32 %v1132_v32, %v961_v33 }
 0x11f   : > { %v1120_v27 = vpop.f32.mrf.mxu2 }
 0x120   : > { %v1133_v28 = vpop.f32.mrf.mxu3 }
 0x130   : > { %v1219_v36 = vpop.f32.mrf.mxu0 }
 0x131   : > { %v1223_v37 = vadd.f32 %v1219_v36, %v1135_v34 }
 0x133   : > { %v1228_v39 = vmul.f32 %v2233_v35, %v1223_v37 }
 0x135   : > { %v1233_v40 = vadd.f32 %v2234_v38, %v1228_v39 }
 0x137   : > { %v1234_v21 = vmax.f32 %v1233_v40, 0.0 }
 0x138   : > { %v1221_v41 = vpop.f32.mrf.mxu0 }
 0x139   : > { %v1242_v42 = vpack.c.bf16 %v1234_v21, %v2472_v22  ;;  %v1408_v43 = vpack.c.bf16 0.0, %v1234_v21  ;;  %v1259_v44 = vpack.c.bf16 %v1234_v21, %v1234_v21 }
 0x13b   : > { %1333 = vmatmul.bf16.vlgmr.msra.gmra.mxu1 %v1259_v44  ;;  %v1339_v45 = vshrl.u32 %v1242_v42, 16  ;;  %v1342_v46 = vshll.u32 %v1242_v42, 16  ;;  %v1429_v47 = vshll.u32 %v1408_v43, 16  ;;  %v1427_v50 = vshrl.u32 %v1408_v43, 16 }
 0x13d   : > { %v1341_v48 = vrot.slane %v1339_v45, 3  ;;  %v1344_v49 = vrot.slane %v1342_v46, 4  ;;  %v1431_v51 = vrot.slane %v1429_v47, 1 }
 0x13f   : > { %v1345_v52 = vor.u32 %v1344_v49, %v1341_v48  ;;  %v1432_v53 = vor.u32 %v1431_v51, %v1427_v50 }
 0x141   : > { %1403 = vmatmul.bf16.vlgmr.msra.gmra.mxu2 %v1345_v52  ;;  %1490 = vmatmul.bf16.vlgmr.msra.gmra.mxu3 %v1432_v53 }
 0x1b8   : > { %v1334_v54 = vpop.f32.mrf.mxu1 }
 0x1c0   : > { %v1336_v55 = vpop.f32.mrf.mxu1 }
 0x1c4   : > { %v1404_v20 = vpop.f32.mrf.mxu2  ;;  %v1491_v22 = vpop.f32.mrf.mxu3 }
 0x1c5   : > { %v1405_v56 = vadd.f32 %v1404_v20, %v1334_v54 }
 0x1c7   : > { %v1495_v58 = vadd.f32 %v1491_v22, %v1405_v56 }
 0x1c9   : > { %v1500_v60 = vmul.f32 %v2235_v57, %v1495_v58 }
 0x1cb   : > { %v1505_v61 = vadd.f32 %v2236_v59, %v1500_v60 }
 0x1cc   : > { %v1406_v62 = vpop.f32.mrf.mxu2  ;;  %v1493_v63 = vpop.f32.mrf.mxu3 }
 0x1cd   : > { %v1506_v0 = vmax.f32 %v1505_v61, 0.0 }
 0x1cf   : > { %1507 = vst [vmem:[%s438_s30] sm:$0xff] %v1506_v0 }
 0x1d0   : > { %2414 = shalt.err (!%p2411_p8)
}
 0x1d1   : > { %2164 = dma.vmem_to_hbm [thread:$0]  (%p2603_p0), %s1522_s16, 128, %s1524_s27, %s1509_s14  }
 0x1d2 PF: > { %s2793_s3 = sld [smem:[#allocation20_spill]]  ;;  %p2795_p10 = scmp.ge.s32.totalorder %s2465_s12, 2 }
 0x1d4   : > { %p2184_p11 = pnand %p2795_p10, %p2611_p6 }
 0x1d6   : > { %p2185_p12 = pneg %p2184_p11 }
 0x1d8   : > { %s1535_s11 = sand.u32 1, %s2793_s3  }
 0x1d9   : > { %s1536_s21 = scalar_lea.sflag [#allocation7], %s1535_s11 }
 0x1da   : > { %2448 = dma.done.wait (%p2185_p12), %s1536_s21, 128  }
 0x1db   : > { %2450 = vsyncadd (%p2185_p12), %s1536_s21, 4294967168  ;;  %s2796_s12 = sld [smem:[#allocation22_spill]]  ;;  %s2799_s30 = smov %s2457_s10 }
 0x1dc   : > { %s2797_s29 = sld [smem:[#allocation21_spill]] }
 0x1dd   : > { %s2798_s11 = sld [smem:[#allocation23_spill]] }
 0x1e1   : > { %p26_p2 = scmp.ge.s32.totalorder %s2796_s12, 4  }
 0x1e2   : > { %s2800_s10 = smov %s2797_s29 }
 0x1e3   :  { %28 = sbr.rel (!%p26_p2) target bundleno = 12 (0xc), region = 132 }
 0x1e8   :  { %1542 = vsyncpa [#allocation6], 1 }
 0x1e9   :  { %1544 = vsyncpa [#allocation6 + $0x1], 1 }
 0x1ea   :  { %1545 = vsyncpa [#allocation9], 1 }
 0x1eb   :  { %1547 = vsyncpa [#allocation9 + $0x1], 1 }
 0x1ec   :  { %1548 = vsyncpa [#allocation12], 1 }
 0x1ed   :  { %1549 = vsyncpa [#allocation7], 1 }
 0x1ee   :  { %1551 = vsyncpa [#allocation7 + $0x1], 1 }

</bundles_post_ra>
